<compile_context>
chip_gen: v6e
topology: v6e:2x2x1
jax: 0.10.0
libtpu: 0.0.40
codegen_flags: <defaults>
</compile_context>

<pallas_src>
import jax
import jax.numpy as jnp
from jax.experimental import pallas as pl
from jax.experimental.pallas import tpu as pltpu


def _fusion_kernel(
    bm_a_ref, bm_v_ref, f_a_ref, f_v_ref,          # data tiles (1, C, tT)
    w_bma_ref, w_bmv_ref, w_fa_ref, w_fv_ref,       # packed weights (2D, C)
    bias_ref,                                       # packed bias (2D, 1)
    out_ref,                                        # (1, D, tT)
):
    """One (batch, T-tile) block.

    pre[:D]  = (Wbm_a@bm_a + Ws_a@f_a + Wo_a@f_v)/3 + bias_a
    pre[D:]  = (Wbm_v@bm_v + Ws_v@f_v + Wo_v@f_a)/3 + bias_v
    a_attn, v_attn = sigmoid(pre[:D]), sigmoid(pre[D:])
    out = (bm_v * v_attn + bm_a * a_attn) / (a_attn + v_attn)
    (1/3 and the per-branch bias packing are folded into the weights/bias.)
    """
    bm_a = bm_a_ref[0]   # (D,  tT)
    bm_v = bm_v_ref[0]   # (D,  tT)
    f_a = f_a_ref[0]     # (Ca, tT)
    f_v = f_v_ref[0]     # (Cv, tT)

    pre = (
        jnp.dot(w_bma_ref[...], bm_a, preferred_element_type=jnp.float32)
        + jnp.dot(w_bmv_ref[...], bm_v, preferred_element_type=jnp.float32)
        + jnp.dot(w_fa_ref[...], f_a, preferred_element_type=jnp.float32)
        + jnp.dot(w_fv_ref[...], f_v, preferred_element_type=jnp.float32)
        + bias_ref[...]
    )  # (2D, tT)

    attn = jax.nn.sigmoid(pre)
    d = bm_a.shape[0]
    a_attn = attn[:d]
    v_attn = attn[d:]
    s = a_attn + v_attn   # sigmoid outputs -> s > 0 always (also on padded cols)
    # Exact divide keeps the 1e-5 allclose tolerance vs. the reference.
    out_ref[0] = (bm_v * v_attn + bm_a * a_attn) / s


def modal_feature_attn_boundary_map_fusion(
    video_feature, audio_feature, video_bm, audio_bm, params, *, t_tile=512
):
    """Forward pass of ModalFeatureAttnBoundaryMapFusion.

    video_feature: (B, Cv, T)  audio_feature: (B, Ca, T)
    video_bm:      (B, D,  T)  audio_bm:      (B, D,  T)
    Returns fused boundary map of shape (B, D, T).
    """
    B, D, T = video_bm.shape
    Cv = video_feature.shape[1]
    Ca = audio_feature.shape[1]
    p = params

    third = jnp.float32(1.0 / 3.0)
    zDD = jnp.zeros((D, D), jnp.float32)

    # Packed (2D, C) weights: rows 0:D feed the audio-attn branch (pre_a),
    # rows D:2D feed the video-attn branch (pre_v).  Conv1d(k=1) weights are
    # already (out, in) so W @ x(C, T) needs no transpose.  1/3 folded in.
    w_bma = jnp.concatenate([p["a_wbm"] * third, zDD], axis=0)             # (2D, D)
    w_bmv = jnp.concatenate([zDD, p["v_wbm"] * third], axis=0)             # (2D, D)
    w_fa = jnp.concatenate(
        [p["a_wself"] * third, p["v_wother"] * third], axis=0)             # (2D, Ca)
    w_fv = jnp.concatenate(
        [p["a_wother"] * third, p["v_wself"] * third], axis=0)             # (2D, Cv)
    bias = jnp.concatenate(
        [(p["a_bbm"] + p["a_bself"] + p["a_bother"]) * third,
         (p["v_bbm"] + p["v_bself"] + p["v_bother"]) * third]
    ).reshape(2 * D, 1).astype(jnp.float32)                                # (2D, 1)

    # Choose a lane-dense T tile.  Full-T blocks are always legal; tiled T
    # blocks must be a multiple of 128, so we pad T up when tiling.
    if T <= t_tile:
        tT, Tp = T, T
    else:
        assert t_tile % 128 == 0, "t_tile must be a multiple of 128"
        tT = t_tile
        Tp = pl.cdiv(T, tT) * tT

    def pad_t(x):
        if Tp == T:
            return x
        return jnp.pad(x, ((0, 0), (0, 0), (0, Tp - T)))

    bm_a = pad_t(audio_bm)
    bm_v = pad_t(video_bm)
    f_a = pad_t(audio_feature)
    f_v = pad_t(video_feature)

    grid = (B, Tp // tT)

    def data_spec(c):
        return pl.BlockSpec((1, c, tT), lambda b, t: (b, 0, t))

    def w_spec(r, c):
        return pl.BlockSpec((r, c), lambda b, t: (0, 0))

    out = pl.pallas_call(
        _fusion_kernel,
        out_shape=jax.ShapeDtypeStruct((B, D, Tp), jnp.float32),
        grid_spec=pltpu.PrefetchScalarGridSpec(
            num_scalar_prefetch=0,
            grid=grid,
            in_specs=[
                data_spec(D),            # audio_bm
                data_spec(D),            # video_bm
                data_spec(Ca),           # audio_feature
                data_spec(Cv),           # video_feature
                w_spec(2 * D, D),        # w_bma (packed)
                w_spec(2 * D, D),        # w_bmv (packed)
                w_spec(2 * D, Ca),       # w_fa  (packed)
                w_spec(2 * D, Cv),       # w_fv  (packed)
                w_spec(2 * D, 1),        # bias  (packed)
            ],
            out_specs=pl.BlockSpec((1, D, tT), lambda b, t: (b, 0, t)),
        ),
        compiler_params=pltpu.CompilerParams(
            dimension_semantics=("parallel", "parallel"),
        ),
    )(bm_a, bm_v, f_a, f_v, w_bma, w_bmv, w_fa, w_fv, bias)

    if Tp != T:
        out = out[:, :, :T]
    return out


def init_params(key, n_video_features, n_audio_features, max_duration):
    """Deterministic synthetic parameters (Conv1d k=1 weights as (out, in))."""
    D = max_duration
    shapes = {
        # a_attn_block: ModalMapAttnBlock(n_audio, n_video, D)
        "a_wbm": (D, D), "a_bbm": (D,),
        "a_wself": (D, n_audio_features), "a_bself": (D,),
        "a_wother": (D, n_video_features), "a_bother": (D,),
        # v_attn_block: ModalMapAttnBlock(n_video, n_audio, D)
        "v_wbm": (D, D), "v_bbm": (D,),
        "v_wself": (D, n_video_features), "v_bself": (D,),
        "v_wother": (D, n_audio_features), "v_bother": (D,),
    }
    params = {}
    keys = jax.random.split(key, len(shapes))
    for k, (name, shp) in zip(keys, sorted(shapes.items())):
        params[name] = (jax.random.normal(k, shp, dtype=jnp.float32) * 0.1)
    return params


def _reference(video_feature, audio_feature, video_bm, audio_bm, p):
    """Plain-JAX reference mirroring the PyTorch forward (NCT layout)."""
    def conv1x1(x, w, b):  # x (B,C,T), w (O,C), b (O,)
        return jnp.einsum("oc,bct->bot", w, x) + b[None, :, None]

    def attn_block(bm, f_self, f_other, wbm, bbm, ws, bs, wo, bo):
        w_bm = conv1x1(bm, wbm, bbm)
        w_s = conv1x1(f_self, ws, bs)
        w_o = conv1x1(f_other, wo, bo)
        return jax.nn.sigmoid((w_bm + w_s + w_o) / 3.0)

    a_attn = attn_block(audio_bm, audio_feature, video_feature,
                        p["a_wbm"], p["a_bbm"], p["a_wself"], p["a_bself"],
                        p["a_wother"], p["a_bother"])
    v_attn = attn_block(video_bm, video_feature, audio_feature,
                        p["v_wbm"], p["v_bbm"], p["v_wself"], p["v_bself"],
                        p["v_wother"], p["v_bother"])
    s = a_attn + v_attn
    return video_bm * (v_attn / s) + audio_bm * (a_attn / s)


if __name__ == "__main__":
    # Small shapes consistent with the module: B=2, C_v=24, C_a=16, D=8, T=16.
    B, Cv, Ca, D, T = 2, 24, 16, 8, 16

    key = jax.random.PRNGKey(0)
    k_in, k_par = jax.random.split(key)
    kv, ka, kbv, kba = jax.random.split(k_in, 4)

    video_feature = jax.random.normal(kv, (B, Cv, T), dtype=jnp.float32)
    audio_feature = jax.random.normal(ka, (B, Ca, T), dtype=jnp.float32)
    video_bm = jax.nn.sigmoid(jax.random.normal(kbv, (B, D, T), dtype=jnp.float32))
    audio_bm = jax.nn.sigmoid(jax.random.normal(kba, (B, D, T), dtype=jnp.float32))

    params = init_params(k_par, Cv, Ca, D)

    out = modal_feature_attn_boundary_map_fusion(
        video_feature, audio_feature, video_bm, audio_bm, params
    )
    out = jax.block_until_ready(out)

    ref = _reference(video_feature, audio_feature, video_bm, audio_bm, params)
    assert out.shape == (B, D, T)
    assert jnp.allclose(out, ref, atol=1e-5, rtol=1e-5), "mismatch vs reference"

    print("KERNEL_OK")
</pallas_src>

<mosaic_0001>
module attributes {stable_mosaic.version = 11 : i64} {
  func.func @_fusion_kernel(%arg0: i32, %arg1: i32, %arg2: memref<1x8x16xf32, #tpu.memory_space<vmem>>, %arg3: memref<1x8x16xf32, #tpu.memory_space<vmem>>, %arg4: memref<1x16x16xf32, #tpu.memory_space<vmem>>, %arg5: memref<1x24x16xf32, #tpu.memory_space<vmem>>, %arg6: memref<16x8xf32, #tpu.memory_space<vmem>>, %arg7: memref<16x8xf32, #tpu.memory_space<vmem>>, %arg8: memref<16x16xf32, #tpu.memory_space<vmem>>, %arg9: memref<16x24xf32, #tpu.memory_space<vmem>>, %arg10: memref<16x1xf32, #tpu.memory_space<vmem>>, %arg11: memref<1x8x16xf32, #tpu.memory_space<vmem>>) attributes {dimension_semantics = [#tpu.dimension_semantics<parallel>, #tpu.dimension_semantics<parallel>], iteration_bounds = array<i64: 2, 1>, scalar_prefetch = 0 : i64, scratch_operands = 0 : i64, tpu.core_type = #tpu.core_type<tc>, window_params = [{transform_indices = @transform_0, window_bounds = array<i64: 1, 8, 16>}, {transform_indices = @transform_1, window_bounds = array<i64: 1, 8, 16>}, {transform_indices = @transform_2, window_bounds = array<i64: 1, 16, 16>}, {transform_indices = @transform_3, window_bounds = array<i64: 1, 24, 16>}, {pipeline_mode = #tpu.pipeline_mode<synchronous>, transform_indices = @transform_4, window_bounds = array<i64: 16, 8>}, {pipeline_mode = #tpu.pipeline_mode<synchronous>, transform_indices = @transform_5, window_bounds = array<i64: 16, 8>}, {pipeline_mode = #tpu.pipeline_mode<synchronous>, transform_indices = @transform_6, window_bounds = array<i64: 16, 16>}, {pipeline_mode = #tpu.pipeline_mode<synchronous>, transform_indices = @transform_7, window_bounds = array<i64: 16, 24>}, {pipeline_mode = #tpu.pipeline_mode<synchronous>, transform_indices = @transform_8, window_bounds = array<i64: 16, 1>}, {transform_indices = @transform_9, window_bounds = array<i64: 1, 8, 16>}]} {
    %c0 = arith.constant 0 : index
    %c0_0 = arith.constant 0 : index
    %c0_1 = arith.constant 0 : index
    %0 = vector.load %arg2[%c0, %c0_0, %c0_1] : memref<1x8x16xf32, #tpu.memory_space<vmem>>, vector<1x8x16xf32>
    %1 = vector.shape_cast %0 : vector<1x8x16xf32> to vector<8x16xf32>
    %c0_2 = arith.constant 0 : index
    %c0_3 = arith.constant 0 : index
    %c0_4 = arith.constant 0 : index
    %2 = vector.load %arg3[%c0_2, %c0_3, %c0_4] : memref<1x8x16xf32, #tpu.memory_space<vmem>>, vector<1x8x16xf32>
    %3 = vector.shape_cast %2 : vector<1x8x16xf32> to vector<8x16xf32>
    %c0_5 = arith.constant 0 : index
    %c0_6 = arith.constant 0 : index
    %c0_7 = arith.constant 0 : index
    %4 = vector.load %arg4[%c0_5, %c0_6, %c0_7] : memref<1x16x16xf32, #tpu.memory_space<vmem>>, vector<1x16x16xf32>
    %5 = vector.shape_cast %4 : vector<1x16x16xf32> to vector<16x16xf32>
    %c0_8 = arith.constant 0 : index
    %c0_9 = arith.constant 0 : index
    %c0_10 = arith.constant 0 : index
    %6 = vector.load %arg5[%c0_8, %c0_9, %c0_10] : memref<1x24x16xf32, #tpu.memory_space<vmem>>, vector<1x24x16xf32>
    %7 = vector.shape_cast %6 : vector<1x24x16xf32> to vector<24x16xf32>
    %c0_11 = arith.constant 0 : index
    %c0_12 = arith.constant 0 : index
    %8 = vector.load %arg6[%c0_11, %c0_12] : memref<16x8xf32, #tpu.memory_space<vmem>>, vector<16x8xf32>
    %cst = arith.constant dense<0.000000e+00> : vector<16x16xf32>
    %9 = tpu.matmul %8, %1, %cst {dimension_numbers = #tpu.dot_dimension_numbers<[1], [0], [0], [1], [0, 0, 1, 1], [], []>} : vector<16x8xf32>, vector<8x16xf32>, vector<16x16xf32> -> vector<16x16xf32>
    %c0_13 = arith.constant 0 : index
    %c0_14 = arith.constant 0 : index
    %10 = vector.load %arg7[%c0_13, %c0_14] : memref<16x8xf32, #tpu.memory_space<vmem>>, vector<16x8xf32>
    %cst_15 = arith.constant dense<0.000000e+00> : vector<16x16xf32>
    %11 = tpu.matmul %10, %3, %cst_15 {dimension_numbers = #tpu.dot_dimension_numbers<[1], [0], [0], [1], [0, 0, 1, 1], [], []>} : vector<16x8xf32>, vector<8x16xf32>, vector<16x16xf32> -> vector<16x16xf32>
    %12 = arith.addf %9, %11 : vector<16x16xf32>
    %c0_16 = arith.constant 0 : index
    %c0_17 = arith.constant 0 : index
    %13 = vector.load %arg8[%c0_16, %c0_17] : memref<16x16xf32, #tpu.memory_space<vmem>>, vector<16x16xf32>
    %cst_18 = arith.constant dense<0.000000e+00> : vector<16x16xf32>
    %14 = tpu.matmul %13, %5, %cst_18 {dimension_numbers = #tpu.dot_dimension_numbers<[1], [0], [0], [1], [0, 0, 1, 1], [], []>} : vector<16x16xf32>, vector<16x16xf32>, vector<16x16xf32> -> vector<16x16xf32>
    %15 = arith.addf %12, %14 : vector<16x16xf32>
    %c0_19 = arith.constant 0 : index
    %c0_20 = arith.constant 0 : index
    %16 = vector.load %arg9[%c0_19, %c0_20] : memref<16x24xf32, #tpu.memory_space<vmem>>, vector<16x24xf32>
    %cst_21 = arith.constant dense<0.000000e+00> : vector<16x16xf32>
    %17 = tpu.matmul %16, %7, %cst_21 {dimension_numbers = #tpu.dot_dimension_numbers<[1], [0], [0], [1], [0, 0, 1, 1], [], []>} : vector<16x24xf32>, vector<24x16xf32>, vector<16x16xf32> -> vector<16x16xf32>
    %18 = arith.addf %15, %17 : vector<16x16xf32>
    %c0_22 = arith.constant 0 : index
    %c0_23 = arith.constant 0 : index
    %19 = vector.load %arg10[%c0_22, %c0_23] : memref<16x1xf32, #tpu.memory_space<vmem>>, vector<16x1xf32>
    %20 = vector.broadcast %19 : vector<16x1xf32> to vector<16x16xf32>
    %21 = arith.addf %18, %20 : vector<16x16xf32>
    %22 = arith.negf %21 : vector<16x16xf32>
    %23 = math.exp %22 : vector<16x16xf32>
    %cst_24 = arith.constant 1.000000e+00 : f32
    %24 = vector.broadcast %cst_24 : f32 to vector<16x16xf32>
    %25 = arith.addf %24, %23 : vector<16x16xf32>
    %26 = arith.divf %24, %25 : vector<16x16xf32>
    %27 = vector.extract_strided_slice %26 {offsets = [0, 0], sizes = [8, 16], strides = [1, 1]} : vector<16x16xf32> to vector<8x16xf32>
    %28 = vector.extract_strided_slice %26 {offsets = [8, 0], sizes = [8, 16], strides = [1, 1]} : vector<16x16xf32> to vector<8x16xf32>
    %29 = arith.addf %27, %28 : vector<8x16xf32>
    %30 = arith.mulf %3, %28 : vector<8x16xf32>
    %31 = arith.mulf %1, %27 : vector<8x16xf32>
    %32 = arith.addf %30, %31 : vector<8x16xf32>
    %33 = arith.divf %32, %29 : vector<8x16xf32>
    %c0_25 = arith.constant 0 : index
    %c0_26 = arith.constant 0 : index
    %c0_27 = arith.constant 0 : index
    %34 = vector.load %arg11[%c0_25, %c0_26, %c0_27] : memref<1x8x16xf32, #tpu.memory_space<vmem>>, vector<1x8x16xf32>
    %35 = vector.shape_cast %34 : vector<1x8x16xf32> to vector<8x16xf32>
    %36 = vector.shape_cast %33 : vector<8x16xf32> to vector<1x8x16xf32>
    tpu.vector_store %arg11[%c0_25, %c0_26, %c0_27], %36 {strides = array<i32>} : memref<1x8x16xf32, #tpu.memory_space<vmem>>, vector<1x8x16xf32>,
    return
  }
  func.func @transform_0(%arg0: i32, %arg1: i32) -> (i32, i32, i32) {
    %c0_i32 = arith.constant 0 : i32
    %c0_i32_0 = arith.constant 0 : i32
    return %arg0, %c0_i32, %arg1 : i32, i32, i32
  }
  func.func @transform_1(%arg0: i32, %arg1: i32) -> (i32, i32, i32) {
    %c0_i32 = arith.constant 0 : i32
    %c0_i32_0 = arith.constant 0 : i32
    return %arg0, %c0_i32, %arg1 : i32, i32, i32
  }
  func.func @transform_2(%arg0: i32, %arg1: i32) -> (i32, i32, i32) {
    %c0_i32 = arith.constant 0 : i32
    %c0_i32_0 = arith.constant 0 : i32
    return %arg0, %c0_i32, %arg1 : i32, i32, i32
  }
  func.func @transform_3(%arg0: i32, %arg1: i32) -> (i32, i32, i32) {
    %c0_i32 = arith.constant 0 : i32
    %c0_i32_0 = arith.constant 0 : i32
    return %arg0, %c0_i32, %arg1 : i32, i32, i32
  }
  func.func @transform_4(%arg0: i32, %arg1: i32) -> (i32, i32) {
    %c0_i32 = arith.constant 0 : i32
    %c0_i32_0 = arith.constant 0 : i32
    %c0_i32_1 = arith.constant 0 : i32
    return %c0_i32, %c0_i32_0 : i32, i32
  }
  func.func @transform_5(%arg0: i32, %arg1: i32) -> (i32, i32) {
    %c0_i32 = arith.constant 0 : i32
    %c0_i32_0 = arith.constant 0 : i32
    %c0_i32_1 = arith.constant 0 : i32
    return %c0_i32, %c0_i32_0 : i32, i32
  }
  func.func @transform_6(%arg0: i32, %arg1: i32) -> (i32, i32) {
    %c0_i32 = arith.constant 0 : i32
    %c0_i32_0 = arith.constant 0 : i32
    %c0_i32_1 = arith.constant 0 : i32
    return %c0_i32, %c0_i32_0 : i32, i32
  }
  func.func @transform_7(%arg0: i32, %arg1: i32) -> (i32, i32) {
    %c0_i32 = arith.constant 0 : i32
    %c0_i32_0 = arith.constant 0 : i32
    %c0_i32_1 = arith.constant 0 : i32
    return %c0_i32, %c0_i32_0 : i32, i32
  }
  func.func @transform_8(%arg0: i32, %arg1: i32) -> (i32, i32) {
    %c0_i32 = arith.constant 0 : i32
    %c0_i32_0 = arith.constant 0 : i32
    %c0_i32_1 = arith.constant 0 : i32
    return %c0_i32, %c0_i32_0 : i32, i32
  }
  func.func @transform_9(%arg0: i32, %arg1: i32) -> (i32, i32, i32) {
    %c0_i32 = arith.constant 0 : i32
    %c0_i32_0 = arith.constant 0 : i32
    return %arg0, %c0_i32, %arg1 : i32, i32, i32
  }
}

</mosaic_0001>

<bundles_post_ra>
// kernel: tpu_custom_call.1
= control target key start
LH: loop header
LB: loop body
LE: loop exit
PB: predicated region body
PF: predicated region fallthrough
CT: control target
= control target key end

     0   :  { %14 = vsyncpa [#allocation3], 0  ;;  %s1379_s0 = inlined_call_operand.vmem [shape: f32[2,8,16], index: 0, kind: input, shape index: {}]   ;;  %s1380_s1 = inlined_call_operand.vmem [shape: f32[2,8,16], index: 1, kind: input, shape index: {}]   ;;  %s1381_s2 = inlined_call_operand.vmem [shape: f32[2,16,16], index: 2, kind: input, shape index: {}]   ;;  %s1382_s3 = inlined_call_operand.vmem [shape: f32[2,24,16], index: 3, kind: input, shape index: {}]   ;;  %s1383_s4 = inlined_call_operand.vmem [shape: f32[16,8], index: 4, kind: input, shape index: {}]   ;;  %s1384_s5 = inlined_call_operand.vmem [shape: f32[16,8], index: 5, kind: input, shape index: {}]   ;;  %s1385_s6 = inlined_call_operand.vmem [shape: f32[16,16], index: 6, kind: input, shape index: {}]   ;;  %s1386_s7 = inlined_call_operand.vmem [shape: f32[16,24], index: 7, kind: input, shape index: {}]   ;;  %s1387_s8 = inlined_call_operand.vmem [shape: f32[16,1], index: 8, kind: input, shape index: {}]   ;;  %s1388_s9 = inlined_call_operand.hbm [shape: f32[2,8,16], index: 9, kind: output, shape index: {}]  }
   0x1   :  { %16 = vsyncpa [#allocation3 + $0x1], 0  ;;  %s1224_s30 = smov 0   ;;  %s1226_s10 = smov 0  }
   0x2   :  { %s1228_s11 = smov 0   ;;  %s1230_s12 = smov 0  }
   0x3   :  { %s1232_s13 = smov 0   ;;  %s1234_s14 = smov 0  }
   0x4 LB: > { %1392 = sst [smem:[#allocation5_spill]] %s1158_s11  ;;  %s959_s15 = sadd.s32 4294967295, %s1170_s14   ;;  %s1170_s14 = sphi %s1234_s14, %s22_s14   ;;  %s1166_s13 = sphi %s1232_s13, %s1401_s13   ;;  %s1162_s12 = sphi %s1230_s12, %s1400_s12   ;;  %s1158_s11 = sphi %s1228_s11, %s1399_s11   ;;  %s1154_s10 = sphi %s1226_s10, %s1403_s10   ;;  %s1150_s30 = sphi %s1224_s30, %s1402_s30  }
   0x5   : > { %1393 = sst [smem:[#allocation6_spill]] %s1166_s13  ;;  %s960_s16 = sadd.s32 4294967294, %s1170_s14  }
   0x6   : > { %s34_s17 = sadd.s32 1, %s1166_s13  ;;  %s260_s18 = sadd.s32 1, %s1158_s11 }
   0x7   : > { %p36_p0 = scmp.ge.s32.totalorder %s34_s17, 2  ;;  %p270_p1 = scmp.ne.s32.totalorder %s1158_s11, %s1154_s10 }
   0x8   : > { %p271_p2 = scmp.eq.s32.totalorder %s959_s15, 1  ;;  %p276_p3 = scmp.ne.s32.totalorder %s1154_s10, %s1150_s30 }
   0x9   : > { %s1405_s17 = smov (%p36_p0, %s34_s17), 0  ;;  %p277_p5 = scmp.eq.s32.totalorder %s960_s16, 1 }
   0xa   : > { %1394 = sst [smem:[#allocation7_spill]] %s1405_s17  ;;  %p1264_p4 = por %p271_p2, %p270_p1 }
   0xb   : > { %s255_s20 = ssub.s32 %s1166_s13, %s1405_s17  ;;  %p963_p6 = scmp.ge.s32.totalorder %s1170_s14, 1 }
   0xc   : > { %p258_p7 = scmp.eq.s32.totalorder %s255_s20, 0  ;;  %p1271_p8 = por %p277_p5, %p276_p3 }
   0xd   : > { %p352_p9 = scmp.lt.s32.totalorder %s1170_s14, 3 }
   0xe   : > { %s1277_s22 = scalar_select %p258_p7, %s1158_s11, %s260_s18  }
   0xf   : > { %p353_p10 = pnand %p963_p6, %p352_p9 }
  0x10   : > { %1397 = sst [smem:[#allocation8_spill]] %s1277_s22  ;;  %p413_p11 = scmp.lt.s32.totalorder (!%p353_p10), %s1162_s12, 1 }
  0x11   : > { %356 = sbr.rel (%p353_p10) target bundleno = 299 (0x12b), region = 56  ;;  %s981_s13 = sshll.u32 (!%p353_p10), %s1162_s12, 7 }
  0x12   : > { %s1173_s24 = smov (!%p353_p10), [#allocation2]  }
  0x16   : > { %v452_v0 = vld [vmem:[%s1384_s5] sm:$0xff]  ;;  %vm454_vm0 = vcmask 64512   ;;  %s414_s27 = scalar_select %p413_p11, %s1162_s12, 1  ;;  %v1172_v2 = vmov 0   ;;  %v453_v4 = vld [vmem:[%s1384_s5 + $0x8] sm:$0xff]  ;;  %vm619_vm1 = vcmask 130048  }
  0x17   : > { %v450_v1 = vld [vmem:[%s1383_s4] sm:$0xff]  ;;  %1002 = vmatprep.mubr.msk.f32.mxu0 %vm454_vm0, %v452_v0  ;;  %1083 = vset.pattern.permute.xlu0 %v1172_v2  ;;  %v451_v7 = vld [vmem:[%s1383_s4 + $0x8] sm:$0xff]  ;;  %vm705_vm2 = vcmask 195584   ;;  %s1098_s12 = sshll.u32 %s1173_s24, 4  ;;  %s1099_s12 = int_to_ptr.vmem [resolvable:$false] %s1098_s12 }
  0x18   : > { %1007 = vmatprep.mubr.msk.f32.mxu1 %vm454_vm0, %v450_v1  ;;  %v789_v3 = vld [vmem:[%s1387_s8] sm:$0xff]  ;;  %s965_s15 = sshll.u32 %s414_s27, 3  ;;  %s984_s16 = sshll.u32 %s414_s27, 4  ;;  %v618_v13 = vld [vmem:[%s1385_s6 + $0x8] sm:$0xff] }
  0x19   : > { %793 = vperm.xlu0 %1083, %v789_v3   ;;  %s426_s23 = scalar_lea.vmem %s1380_s1, %s965_s15  ;;  %s419_s26 = scalar_lea.vmem %s1379_s0, %s965_s15  ;;  %v617_v12 = vld [vmem:[%s1385_s6] sm:$0xff]  ;;  %v790_v16 = vld [vmem:[%s1387_s8 + $0x8] sm:$0xff] }
  0x1a   : > { %v1301_v5 = vld [vmem:[%s426_s23] sm:$0xff]  ;;  %s434_s18 = scalar_lea.vmem %s1381_s2, %s984_s16  ;;  %s1026_s20 = smul.u32 24, %s414_s27  ;;  %v704_v17 = vld [vmem:[%s1386_s7 + $0x8] sm:$0xff] }
  0x1b   : > { %v1303_v6 = vld [vmem:[%s419_s26] sm:$0xff]  ;;  %1000 = vmatprep.subr.mxu0 %v1301_v5  ;;  %v446_v8 = vld [vmem:[%s434_s18 + $0x8] sm:$0xff]  ;;  %s835_s27 = scalar_lea.hbm %s1388_s9, %s981_s13  ;;  %s1100_s25 = scalar_lea.vmem %s1099_s12, 256 }
  0x1c   : > { %1005 = vmatprep.subr.mxu1 %v1303_v6  ;;  %1001 = vmatpush3.msra.mxu0 %v1301_v5  ;;  %s442_s15 = scalar_lea.vmem %s1382_s3, %s1026_s20  ;;  %v445_v10 = vld [vmem:[%s434_s18] sm:$0xff]  ;;  %s410_s18 = sand.u32 1, %s1154_s10  }
  0x1d   : > { %1006 = vmatpush3.msra.mxu1 %v1303_v6  ;;  %1003 = vmatmul.mubr.msk.f32.vlgmr.msra.gmra.mxu0 %vm454_vm0, %v453_v4  ;;  %v449_v9 = vld [vmem:[%s442_s15 + $0x10] sm:$0xff]  ;;  %v448_v11 = vld [vmem:[%s442_s15 + $0x8] sm:$0xff]  ;;  %v447_v14 = vld [vmem:[%s442_s15] sm:$0xff]  ;;  %s964_s20 = sshll.u32 %s410_s18, 3  ;;  %s823_s16 = scalar_lea.sflag [#allocation3], %s410_s18 }
  0x1e   : > { %1008 = vmatmul.mubr.msk.f32.vlgmr.msra.gmra.mxu1 %vm454_vm0, %v451_v7  ;;  %1010 = vmatprep.subr.mxu0 %v446_v8  ;;  %v703_v15 = vld [vmem:[%s1386_s7] sm:$0xff]  ;;  %s412_s17 = scalar_lea.vmem [#allocation2], %s964_s20 }
  0x1f   : > { %1017 = vmatprep.subr.mxu1 %v449_v9  ;;  %1011 = vmatpush3.msra.mxu0 %v446_v8  ;;  %s837_s15 = sshll.u32 %s412_s17, 4  ;;  %s838_s15 = int_to_ptr.vmem [resolvable:$true] %s837_s15 }
  0x20   : > { %1018 = vmatpush3.msra.mxu1 %v449_v9  ;;  %1012 = vmatprep.subr.mxu0 %v445_v10  ;;  %s1094_s23 = scalar_lea.vmem %s838_s15, 128  ;;  %p1101_p1 = scmp.lt.s32.totalorder %s838_s15, %s1099_s12 }
  0x21   : > { %1019 = vmatprep.subr.mxu1 %v448_v11  ;;  %1013 = vmatpush3.msra.mxu0 %v445_v10  ;;  %p1095_p12 = scmp.ne.s32.totalorder %s838_s15, %s1094_s23  ;;  %p1102_p2 = scmp.lt.s32.totalorder %s1100_s25, %s1094_s23 }
  0x22   : > { %1014 = vmatprep.mubr.msk.f32.mxu0 %vm619_vm1, %v617_v12  ;;  %1020 = vmatpush3.msra.mxu1 %v448_v11 }
  0x23   : > { %1015 = vmatmul.mubr.msk.f32.vlgmr.msra.gmra.mxu0 %vm619_vm1, %v618_v13  ;;  %1021 = vmatprep.subr.mxu1 %v447_v14  ;;  %p1096_p13 = pnand %p1095_p12, %p1264_p4  ;;  %p1103_p3 = por %p1102_p2, %p1101_p1 }
  0x24   : > { %1023 = vmatprep.mubr.msk.f32.mxu1 %vm705_vm2, %v703_v15  ;;  %1022 = vmatpush3.msra.mxu1 %v447_v14 }
  0x25   : > { %798 = vperm.xlu0 %1083, %v790_v16   ;;  %1024 = vmatmul.mubr.msk.f32.vlgmr.msra.gmra.mxu1 %vm705_vm2, %v704_v17  ;;  %p1097_p0 = pneg %p1096_p13 }
  0x27   : > { %p1104_p5 = pnand %p1103_p3, %p1097_p0 }
  0x94   : > { %v794_v23 = vpop.permute.xlu0 %793 }
  0xa0   : > { %v799_v31 = vpop.permute.xlu0 %798 }
  0xdd   : > { %v1004_v18 = vpop.f32.mrf.mxu0 }
  0xde   : > { %v1009_v19 = vpop.f32.mrf.mxu1 }
  0xdf   : > { %v527_v20 = vpop.f32.mrf.mxu0  ;;  %v614_v22 = vadd.f32 %v1009_v19, %v1004_v18 }
  0xe0   : > { %v608_v21 = vpop.f32.mrf.mxu1 }
  0xe1   : > { %v609_v25 = vadd.f32 %v608_v21, %v527_v20 }
  0xe3   : > { %v1016_v24 = vpop.f32.mrf.mxu0 }
  0xe4   : > { %v702_v26 = vadd.f32 %v1016_v24, %v614_v22 }
  0xe5   : > { %v692_v27 = vpop.f32.mrf.mxu0  ;;  %v1025_v29 = vpop.f32.mrf.mxu1 }
  0xe6   : > { %v701_v28 = vadd.f32 %v692_v27, %v609_v25  ;;  %v788_v30 = vadd.f32 %v1025_v29, %v702_v26 }
  0xe7   : > { %v778_v32 = vpop.f32.mrf.mxu1 }
  0xe8   : > { %v802_v33 = vadd.f32 %v799_v31, %v788_v30  ;;  %v787_v34 = vadd.f32 %v778_v32, %v701_v28 }
  0xea   : > { %v979_v35 = vmul.f32 -1.442695, %v802_v33  ;;  %v801_v36 = vadd.f32 %v794_v23, %v787_v34 }
  0xec   : > { %1084 = vpow2.f32 %v979_v35  ;;  %v978_v37 = vmul.f32 -1.442695, %v801_v36 }
  0xee   : > { %1086 = vpow2.f32 %v978_v37 }
  0xf9   : > { %v1085_v38 = vpop.eup %1084 }
  0xfa   : > { %v810_v39 = vadd.f32 1.0, %v1085_v38 }
  0xfb   : > { %v1087_v40 = vpop.eup %1086 }
  0xfc   : > { %v809_v41 = vadd.f32 1.0, %v1087_v40  ;;  %1088 = vrcp.f32 %v810_v39 }
  0xfe   : > { %1090 = vrcp.f32 %v809_v41 }
 0x109   : > { %v1089_v42 = vpop.eup %1088 }
 0x10a   : > { %v816_v46 = vmul.f32 %v1089_v42, %v1301_v5 }
 0x10b   : > { %v1091_v43 = vpop.eup %1090 }
 0x10c   : > { %v815_v44 = vadd.f32 %v1091_v43, %v1089_v42  ;;  %v817_v45 = vmul.f32 %v1091_v43, %v1303_v6 }
 0x10e   : > { %1092 = vrcp.f32 %v815_v44  ;;  %v818_v47 = vadd.f32 %v817_v45, %v816_v46 }
 0x11b   : > { %v1093_v48 = vpop.eup %1092 }
 0x11c   : > { %v820_v49 = vmul.f32 %v1093_v48, %v818_v47 }
 0x11e   : > { %821 = vst.msk [vmem:[%s412_s17] sm:$0xff] %vm619_vm1, %v820_v49 }
 0x11f   : > { %1107 = shalt.err (!%p1104_p5)
}
 0x120   : > { %s1108_s26 = scalar_lea.hbm %s835_s27, 128  ;;  %s1112_s18 = scalar_lea.hbm %s1388_s9, 256 }
 0x121   : > { %p1109_p6 = scmp.ne.s32.totalorder %s835_s27, %s1108_s26  ;;  %p1113_p10 = scmp.lt.s32.totalorder %s835_s27, %s1388_s9 }
 0x122   : > { %p1114_p11 = scmp.lt.s32.totalorder %s1112_s18, %s1108_s26 }
 0x123   : > { %p1110_p7 = pnand %p1109_p6, %p1264_p4 }
 0x124   : > { %p1115_p12 = por %p1114_p11, %p1113_p10 }
 0x125   : > { %p1111_p9 = pneg %p1110_p7 }
 0x127   : > { %p1116_p13 = pnand %p1115_p12, %p1111_p9 }
 0x129   : > { %1119 = shalt.err (!%p1116_p13)
}
 0x12a   : > { %1027 = dma.vmem_to_hbm [thread:$0]  (%p1264_p4), %s838_s15, 128, %s835_s27, %s823_s16  }
 0x12b PF: > { %p1033_p0 = scmp.ge.s32.totalorder %s1170_s14, 2  ;;  %s849_s17 = sand.u32 1, %s1150_s30  }
 0x12c   : > { %s850_s11 = scalar_lea.sflag [#allocation3], %s849_s17 }
 0x12d   : > { %p1030_p1 = pnand %p1033_p0, %p1271_p8 }
 0x12f   : > { %p1031_p2 = pneg %p1030_p1 }
 0x131   : > { %1145 = dma.done.wait (%p1031_p2), %s850_s11, 128  }
 0x132   : > { %1147 = vsyncadd (%p1031_p2), %s850_s11, 4294967168  ;;  %s22_s14 = sadd.s32 1, %s1170_s14   ;;  %s1398_s22 = sld [smem:[#allocation5_spill]] }
 0x133   : > { %p19_p3 = scmp.ge.s32.totalorder %s22_s14, 4   ;;  %s1399_s11 = sld [smem:[#allocation8_spill]] }
 0x134   : > { %s1400_s12 = sld [smem:[#allocation6_spill]]  ;;  %s1402_s30 = smov %s1154_s10 }
 0x135   : > { %s1401_s13 = sld [smem:[#allocation7_spill]]  ;;  %21 = sbr.rel (!%p19_p3) target bundleno = 4 (0x4), region = 100 }
 0x138   : > { %s1403_s10 = smov %s1398_s22 }
 0x13a   :  { %855 = vsyncpa [#allocation3], 1 }
 0x13b   :  { %857 = vsyncpa [#allocation3 + $0x1], 1 }

</bundles_post_ra>
